<compile_context>
chip_gen: v7x
topology: tpu7x:2x2x1
jax: 0.10.0
libtpu: 0.0.40
codegen_flags: <defaults>
</compile_context>

<pallas_src>
import functools

import jax
import jax.numpy as jnp
import numpy as np
from jax import lax
from jax.experimental import pallas as pl
from jax.experimental.pallas import tpu as pltpu


def _conv_gemm_kernel(xf_ref, w_ref, o_ref, p_ref, *, C, KH, KW, W, HW):
    """One batch element per grid step.

    xf_ref: (C, H*W)          channel-major flattened input for batch n
    w_ref : (O, KH*KW*C)      tap-major flattened OIHW weights (resident in VMEM)
    o_ref : (O, H*W)          flattened output (wrapper slices valid OHxOW window)
    p_ref : (KH*KW*C, H*W)    VMEM scratch: tap-major im2col patch matrix
    """
    xf = xf_ref[...]                                   # (C, HW)

    # Tap-major patch assembly: one XLU lane-rotation + one full-width dense
    # (C, HW) store per (kh, kw) tap.  rolled[:, col] == xf[:, (col+off) % HW],
    # which equals the true patch value for every valid output column
    # (h < OH, w < OW); wrapped columns are discarded by the wrapper.
    for kh in range(KH):
        for kw in range(KW):
            t = kh * KW + kw
            off = kh * W + kw
            if off == 0:
                p_ref[pl.ds(0, C), :] = xf
            else:
                p_ref[pl.ds(t * C, C), :] = pltpu.roll(xf, HW - off, 1)

    # Single MXU GEMM produces every output channel for this batch element.
    o_ref[...] = jnp.dot(w_ref[...], p_ref[...],
                         preferred_element_type=jnp.float32)


def conv2d_valid(x, w):
    """aten.convolution(x, w, bias=None, stride=1, padding=0, dilation=1, groups=1)."""
    N, C, H, W = x.shape
    O, C_w, KH, KW = w.shape
    assert C == C_w
    OH, OW = H - KH + 1, W - KW + 1
    HW = H * W
    CKK = C * KH * KW

    # Free wrapper-side layout plumbing:
    #   xf[n, c, h*W + w]           = x[n, c, h, w]
    #   w2[o, (kh*KW + kw)*C + c]   = w[o, c, kh, kw]   (tap-major, matches p_ref rows)
    xf = x.reshape(N, C, HW)
    w2 = jnp.transpose(w, (0, 2, 3, 1)).reshape(O, CKK)

    kernel = functools.partial(_conv_gemm_kernel, C=C, KH=KH, KW=KW, W=W, HW=HW)

    yf = pl.pallas_call(
        kernel,
        out_shape=jax.ShapeDtypeStruct((N, O, HW), jnp.float32),
        grid=(N,),  # pipeline over batch; weights stay resident
        in_specs=[
            pl.BlockSpec((None, C, HW), lambda n: (n, 0, 0)),   # per-batch image tile
            pl.BlockSpec((O, CKK), lambda n: (0, 0)),           # resident weights
        ],
        out_specs=pl.BlockSpec((None, O, HW), lambda n: (n, 0, 0)),
        scratch_shapes=[pltpu.VMEM((CKK, HW), jnp.float32)],
        compiler_params=pltpu.CompilerParams(
            # Batch axis is independent -> shard across TensorCores on v7x.
            dimension_semantics=("parallel",),
            # Tiny footprint here; set vmem_limit_bytes explicitly if shapes
            # grow (default scoped VMEM: 16 MiB v5e, 32 MiB v6e/v7x).
        ),
    )(xf, w2)

    # yf[n, o, h*W + w] == y[n, o, h, w] for h < OH, w < OW (NCHW already).
    return yf.reshape(N, O, H, W)[:, :, :OH, :OW]


if __name__ == "__main__":
    key = jax.random.PRNGKey(0)
    kx, kw_key = jax.random.split(key, 2)

    # Small shapes consistent with the (fully dynamic) module: NCHW / OIHW.
    N, C, H, W = 2, 4, 16, 16
    O, KH, KW = 8, 3, 3

    x = jax.random.normal(kx, (N, C, H, W), dtype=jnp.float32)
    fan_in = C * KH * KW
    bound = 1.0 / np.sqrt(fan_in)
    w = jax.random.uniform(kw_key, (O, C, KH, KW), jnp.float32, -bound, bound)

    out = jax.block_until_ready(conv2d_valid(x, w))

    # Reference: XLA conv with torch.nn semantics (NCHW/OIHW, VALID, no bias).
    ref = lax.conv_general_dilated(
        x, w, window_strides=(1, 1), padding="VALID",
        dimension_numbers=("NCHW", "OIHW", "NCHW"),
        precision=lax.Precision.HIGHEST,
    )

    assert out.shape == (N, O, H - KH + 1, W - KW + 1)
    np.testing.assert_allclose(np.asarray(out), np.asarray(ref), rtol=1e-4, atol=1e-4)
    print("KERNEL_OK")
</pallas_src>

<mosaic_0001>
module attributes {stable_mosaic.version = 11 : i64} {
  func.func @_conv_gemm_kernel(%arg0: i32, %arg1: memref<1x4x256xf32, #tpu.memory_space<vmem>>, %arg2: memref<8x36xf32, #tpu.memory_space<vmem>>, %arg3: memref<1x8x256xf32, #tpu.memory_space<vmem>>, %arg4: memref<36x256xf32, #tpu.memory_space<vmem>>) attributes {dimension_semantics = [#tpu.dimension_semantics<parallel>], iteration_bounds = array<i64: 2>, scalar_prefetch = 0 : i64, scratch_operands = 1 : i64, tpu.core_type = #tpu.core_type<tc>, window_params = [{transform_indices = @transform_0, window_bounds = array<i64: 1, 4, 256>}, {pipeline_mode = #tpu.pipeline_mode<synchronous>, transform_indices = @transform_1, window_bounds = array<i64: 8, 36>}, {transform_indices = @transform_2, window_bounds = array<i64: 1, 8, 256>}]} {
    %c0 = arith.constant 0 : index
    %c0_0 = arith.constant 0 : index
    %c0_1 = arith.constant 0 : index
    %0 = vector.load %arg1[%c0, %c0_0, %c0_1] : memref<1x4x256xf32, #tpu.memory_space<vmem>>, vector<1x4x256xf32>
    %1 = vector.shape_cast %0 : vector<1x4x256xf32> to vector<4x256xf32>
    %c0_2 = arith.constant 0 : index
    %c0_3 = arith.constant 0 : index
    %2 = vector.load %arg4[%c0_2, %c0_3] : memref<36x256xf32, #tpu.memory_space<vmem>>, vector<4x256xf32>
    tpu.vector_store %arg4[%c0_2, %c0_3], %1 {strides = array<i32>} : memref<36x256xf32, #tpu.memory_space<vmem>>, vector<4x256xf32>,
    %c255_i32 = arith.constant 255 : i32
    %3 = tpu.dynamic_rotate %1 by %c255_i32 dim 1 : vector<4x256xf32>, i32 -> vector<4x256xf32>
    %c4 = arith.constant 4 : index
    %c0_4 = arith.constant 0 : index
    %4 = vector.load %arg4[%c4, %c0_4] : memref<36x256xf32, #tpu.memory_space<vmem>>, vector<4x256xf32>
    tpu.vector_store %arg4[%c4, %c0_4], %3 {strides = array<i32>} : memref<36x256xf32, #tpu.memory_space<vmem>>, vector<4x256xf32>,
    %c254_i32 = arith.constant 254 : i32
    %5 = tpu.dynamic_rotate %1 by %c254_i32 dim 1 : vector<4x256xf32>, i32 -> vector<4x256xf32>
    %c8 = arith.constant 8 : index
    %c0_5 = arith.constant 0 : index
    %6 = vector.load %arg4[%c8, %c0_5] : memref<36x256xf32, #tpu.memory_space<vmem>>, vector<4x256xf32>
    tpu.vector_store %arg4[%c8, %c0_5], %5 {strides = array<i32>} : memref<36x256xf32, #tpu.memory_space<vmem>>, vector<4x256xf32>,
    %c240_i32 = arith.constant 240 : i32
    %7 = tpu.dynamic_rotate %1 by %c240_i32 dim 1 : vector<4x256xf32>, i32 -> vector<4x256xf32>
    %c12 = arith.constant 12 : index
    %c0_6 = arith.constant 0 : index
    %8 = vector.load %arg4[%c12, %c0_6] : memref<36x256xf32, #tpu.memory_space<vmem>>, vector<4x256xf32>
    tpu.vector_store %arg4[%c12, %c0_6], %7 {strides = array<i32>} : memref<36x256xf32, #tpu.memory_space<vmem>>, vector<4x256xf32>,
    %c239_i32 = arith.constant 239 : i32
    %9 = tpu.dynamic_rotate %1 by %c239_i32 dim 1 : vector<4x256xf32>, i32 -> vector<4x256xf32>
    %c16 = arith.constant 16 : index
    %c0_7 = arith.constant 0 : index
    %10 = vector.load %arg4[%c16, %c0_7] : memref<36x256xf32, #tpu.memory_space<vmem>>, vector<4x256xf32>
    tpu.vector_store %arg4[%c16, %c0_7], %9 {strides = array<i32>} : memref<36x256xf32, #tpu.memory_space<vmem>>, vector<4x256xf32>,
    %c238_i32 = arith.constant 238 : i32
    %11 = tpu.dynamic_rotate %1 by %c238_i32 dim 1 : vector<4x256xf32>, i32 -> vector<4x256xf32>
    %c20 = arith.constant 20 : index
    %c0_8 = arith.constant 0 : index
    %12 = vector.load %arg4[%c20, %c0_8] : memref<36x256xf32, #tpu.memory_space<vmem>>, vector<4x256xf32>
    tpu.vector_store %arg4[%c20, %c0_8], %11 {strides = array<i32>} : memref<36x256xf32, #tpu.memory_space<vmem>>, vector<4x256xf32>,
    %c224_i32 = arith.constant 224 : i32
    %13 = tpu.dynamic_rotate %1 by %c224_i32 dim 1 : vector<4x256xf32>, i32 -> vector<4x256xf32>
    %c24 = arith.constant 24 : index
    %c0_9 = arith.constant 0 : index
    %14 = vector.load %arg4[%c24, %c0_9] : memref<36x256xf32, #tpu.memory_space<vmem>>, vector<4x256xf32>
    tpu.vector_store %arg4[%c24, %c0_9], %13 {strides = array<i32>} : memref<36x256xf32, #tpu.memory_space<vmem>>, vector<4x256xf32>,
    %c223_i32 = arith.constant 223 : i32
    %15 = tpu.dynamic_rotate %1 by %c223_i32 dim 1 : vector<4x256xf32>, i32 -> vector<4x256xf32>
    %c28 = arith.constant 28 : index
    %c0_10 = arith.constant 0 : index
    %16 = vector.load %arg4[%c28, %c0_10] : memref<36x256xf32, #tpu.memory_space<vmem>>, vector<4x256xf32>
    tpu.vector_store %arg4[%c28, %c0_10], %15 {strides = array<i32>} : memref<36x256xf32, #tpu.memory_space<vmem>>, vector<4x256xf32>,
    %c222_i32 = arith.constant 222 : i32
    %17 = tpu.dynamic_rotate %1 by %c222_i32 dim 1 : vector<4x256xf32>, i32 -> vector<4x256xf32>
    %c32 = arith.constant 32 : index
    %c0_11 = arith.constant 0 : index
    %18 = vector.load %arg4[%c32, %c0_11] : memref<36x256xf32, #tpu.memory_space<vmem>>, vector<4x256xf32>
    tpu.vector_store %arg4[%c32, %c0_11], %17 {strides = array<i32>} : memref<36x256xf32, #tpu.memory_space<vmem>>, vector<4x256xf32>,
    %c0_12 = arith.constant 0 : index
    %c0_13 = arith.constant 0 : index
    %19 = vector.load %arg2[%c0_12, %c0_13] : memref<8x36xf32, #tpu.memory_space<vmem>>, vector<8x36xf32>
    %c0_14 = arith.constant 0 : index
    %c0_15 = arith.constant 0 : index
    %20 = vector.load %arg4[%c0_14, %c0_15] : memref<36x256xf32, #tpu.memory_space<vmem>>, vector<36x256xf32>
    %cst = arith.constant dense<0.000000e+00> : vector<8x256xf32>
    %21 = tpu.matmul %19, %20, %cst {dimension_numbers = #tpu.dot_dimension_numbers<[1], [0], [0], [1], [0, 0, 1, 1], [], []>} : vector<8x36xf32>, vector<36x256xf32>, vector<8x256xf32> -> vector<8x256xf32>
    %c0_16 = arith.constant 0 : index
    %c0_17 = arith.constant 0 : index
    %c0_18 = arith.constant 0 : index
    %22 = vector.load %arg3[%c0_16, %c0_17, %c0_18] : memref<1x8x256xf32, #tpu.memory_space<vmem>>, vector<1x8x256xf32>
    %23 = vector.shape_cast %22 : vector<1x8x256xf32> to vector<8x256xf32>
    %24 = vector.shape_cast %21 : vector<8x256xf32> to vector<1x8x256xf32>
    tpu.vector_store %arg3[%c0_16, %c0_17, %c0_18], %24 {strides = array<i32>} : memref<1x8x256xf32, #tpu.memory_space<vmem>>, vector<1x8x256xf32>,
    return
  }
  func.func @transform_0(%arg0: i32) -> (i32, i32, i32) {
    %c0_i32 = arith.constant 0 : i32
    %c0_i32_0 = arith.constant 0 : i32
    %c0_i32_1 = arith.constant 0 : i32
    return %arg0, %c0_i32, %c0_i32_0 : i32, i32, i32
  }
  func.func @transform_1(%arg0: i32) -> (i32, i32) {
    %c0_i32 = arith.constant 0 : i32
    %c0_i32_0 = arith.constant 0 : i32
    %c0_i32_1 = arith.constant 0 : i32
    return %c0_i32, %c0_i32_0 : i32, i32
  }
  func.func @transform_2(%arg0: i32) -> (i32, i32, i32) {
    %c0_i32 = arith.constant 0 : i32
    %c0_i32_0 = arith.constant 0 : i32
    %c0_i32_1 = arith.constant 0 : i32
    return %arg0, %c0_i32, %c0_i32_0 : i32, i32, i32
  }
}

</mosaic_0001>

<bundles_post_ra>
// kernel: tpu_custom_call.1
= control target key start
LH: loop header
LB: loop body
LE: loop exit
PB: predicated region body
PF: predicated region fallthrough
CT: control target
= control target key end

     0   :  { %7 = vsyncpa [#allocation4], 0  ;;  %s932_s0 = inlined_call_operand.hbm [shape: f32[2,4,256], index: 0, kind: input, shape index: {}]   ;;  %s933_s1 = inlined_call_operand.hbm [shape: f32[8,36], index: 1, kind: input, shape index: {}]   ;;  %s934_s2 = inlined_call_operand.hbm [shape: f32[2,8,256], index: 2, kind: output, shape index: {}]  }
   0x1   :  { %9 = vsyncpa [#allocation4 + $0x1], 0 }
   0x2   :  { %10 = vsyncpa [#allocation7], 0 }
   0x3   :  { %11 = vsyncpa [#allocation5], 0 }
   0x4   :  { %13 = vsyncpa [#allocation5 + $0x1], 0  ;;  %s720_s9 = smov 0   ;;  %s722_s10 = smov 0  }
   0x5   :  { %s724_s11 = smov 0   ;;  %s726_s12 = smov 0  }
   0x6 LB: > { %s741_s13 = sadd.s32 4294967295, %s691_s12   ;;  %s467_s14 = sadd.s32 4294967294, %s691_s12   ;;  %s691_s12 = sphi %s726_s12, %s958_s12   ;;  %s687_s11 = sphi %s724_s11, %s957_s11   ;;  %s683_s10 = sphi %s722_s10, %s956_s10   ;;  %s679_s9 = sphi %s720_s9, %s955_s9  }
   0x7   : > { %p39_p0 = scmp.ne.s32.totalorder %s683_s10, %s679_s9  ;;  %p935_p1 = scmp.eq.s32.totalorder %s741_s13, 0 }
   0x8   : > { %p90_p3 = scmp.eq.s32.totalorder %s467_s14, 1  ;;  %p468_p5 = scmp.ge.s32.totalorder %s691_s12, 1 }
   0x9   : > { %p750_p4 = por %p935_p1, %p39_p0  ;;  %p97_p7 = scmp.lt.s32.totalorder %s691_s12, 3 }
   0xa   : > { %p755_p6 = por %p90_p3, %p39_p0  ;;  %s693_s18 = smov [#allocation6]  }
   0xb   : > { %s938_s15 = scalar_select %p750_p4, 1, 0 }
   0xc   : > { %s939_s16 = scalar_select %p755_p6, 1, 0 }
   0xd   : > { %p760_p8 = pnand %p468_p5, %p97_p7  ;;  %s110_s19 = sshll.u32 %s693_s18, 4  ;;  %s111_s19 = int_to_ptr.vmem [resolvable:$true] %s110_s19 }
   0xe   : > { %s768_s20 = sadd.s32 1, %s691_s12   ;;  %s26_s24 = sadd.s32 1, %s687_s11 }
   0xf   : > { %s940_s17 = scalar_select %p760_p8, 1, 0 }
  0x10   : > { %p504_p10 = pneg %p760_p8  ;;  %s23_s22 = ssub.s32 %s691_s12, %s768_s20 }
  0x11   : > { %p778_p12 = scmp.eq.s32.totalorder %s23_s22, 0  ;;  %s563_s27 = scalar_lea.hbm %s933_s1, 128 }
  0x12   : > { %p772_p11 = pnand %p504_p10, %p935_p1  ;;  %p564_p0 = scmp.ne.s32.totalorder %s933_s1, %s563_s27 }
  0x13   : > { %s942_s23 = scalar_select %p778_p12, 1, 0 }
  0x14   : > { %p565_p3 = pneg %p772_p11  ;;  %p570_p10 = scmp.lt.u32.totalorder %s563_s27, %s933_s1 }
  0x16   : > { %p566_p5 = pnand %p565_p3, %p564_p0 }
  0x18   : > { %p567_p7 = pneg %p566_p5 }
  0x1a   : > { %p572_p9 = pnand %p570_p10, %p567_p7 }
  0x1c   : > { %575 = shalt.err (!%p572_p9)
}
  0x1d   : > { %s576_s4 = scalar_lea.vmem %s111_s19, 128  ;;  %p584_p6 = scmp.lt.s32.totalorder %s111_s19, %s111_s19 }
  0x1e   : > { %p577_p1 = scmp.ne.s32.totalorder %s111_s19, %s576_s4  ;;  %p585_p4 = scmp.lt.s32.totalorder %s576_s4, %s576_s4 }
  0x20   : > { %p579_p2 = pnand %p577_p1, %p565_p3  ;;  %p586_p8 = por %p585_p4, %p584_p6 }
  0x22   : > { %p580_p13 = pneg %p579_p2 }
  0x24   : > { %p587_p12 = pnand %p586_p8, %p580_p13 }
  0x26   : > { %590 = shalt.err (!%p587_p12)
}
  0x27   : > { %507 = dma.hbm_to_vmem [thread:$0]  (!%p772_p11), %s933_s1, 128, %s111_s19, [#allocation7]  }
  0x28   : > { %p943_p1 = scmp.ne.s32.totalorder %s942_s23, 0  ;;  %p34_p2 = scmp.eq.s32.totalorder %s691_s12, 0 }
  0x29   : > { %p944_p4 = scmp.ne.s32.totalorder %s687_s11, %s683_s10  ;;  %p945_p6 = scmp.eq.s32.totalorder %s741_s13, 1 }
  0x2a   : > { %s804_s7 = scalar_select %p943_p1, %s687_s11, %s26_s24  }
  0x2b   : > { %p812_p8 = por %p945_p6, %p944_p4  ;;  %p517_p9 = scmp.lt.s32.totalorder %s691_s12, 2 }
  0x2c   : > { %s121_s14 = sand.u32 1, %s687_s11   ;;  %p947_p12 = pmov %p944_p4 }
  0x2d   : > { %s471_s18 = sshll.u32 %s121_s14, 3  ;;  %s486_s21 = sshll.u32 %s691_s12, 7 }
  0x2e   : > { %p35_p13 = por %p34_p2, %p947_p12  ;;  %s825_s19 = scalar_lea.hbm %s932_s0, %s486_s21 }
  0x2f   : > { %s125_s23 = scalar_lea.vmem [#allocation3], %s471_s18  ;;  %s122_s27 = scalar_lea.sflag [#allocation4], %s121_s14 }
  0x30   : > { %s133_s24 = sshll.u32 %s125_s23, 4  ;;  %p827_p11 = pnand %p517_p9, %p35_p13  ;;  %s831_s24 = int_to_ptr.vmem [resolvable:$true] %s133_s24 }
  0x31   : > { %s591_s28 = scalar_lea.hbm %s825_s19, 128  ;;  %s596_s3 = scalar_lea.hbm %s932_s0, 256 }
  0x32   : > { %p592_p0 = scmp.ne.s32.totalorder %s825_s19, %s591_s28  ;;  %p593_p3 = pneg %p827_p11 }
  0x33   : > { %p597_p10 = scmp.lt.u32.totalorder %s825_s19, %s932_s0  ;;  %p598_p1 = scmp.lt.u32.totalorder %s596_s3, %s591_s28 }
  0x34   : > { %p594_p5 = pnand %p593_p3, %p592_p0  ;;  %p600_p4 = scmp.lt.u32.totalorder %s591_s28, %s825_s19 }
  0x35   : > { %p599_p2 = por %p598_p1, %p597_p10 }
  0x36   : > { %p595_p7 = pneg %p594_p5 }
  0x37   : > { %p601_p6 = por %p600_p4, %p599_p2 }
  0x39   : > { %p602_p9 = pnand %p601_p6, %p595_p7 }
  0x3b   : > { %605 = shalt.err (!%p602_p9)
}
  0x3c   : > { %s606_s6 = scalar_lea.vmem %s831_s24, 128  ;;  %s694_s14 = smov [#allocation3]  }
  0x3d   : > { %p607_p12 = scmp.ne.s32.totalorder %s831_s24, %s606_s6  ;;  %s611_s18 = sshll.u32 %s694_s14, 4  ;;  %s612_s18 = int_to_ptr.vmem [resolvable:$false] %s611_s18 }
  0x3e   : > { %s613_s21 = scalar_lea.vmem %s612_s18, 256  ;;  %p614_p5 = scmp.lt.s32.totalorder %s831_s24, %s612_s18 }
  0x3f   : > { %p609_p13 = pnand %p607_p12, %p593_p3  ;;  %p615_p10 = scmp.lt.s32.totalorder %s613_s21, %s606_s6 }
  0x41   : > { %p610_p0 = pneg %p609_p13  ;;  %p616_p1 = por %p615_p10, %p614_p5 }
  0x43   : > { %p617_p2 = pnand %p616_p1, %p610_p0 }
  0x45   : > { %620 = shalt.err (!%p617_p2)
}
  0x46   : > { %511 = dma.hbm_to_vmem [thread:$0]  (!%p827_p11), %s825_s19, 128, %s831_s24, %s122_s27  }
  0x47   : > { %p949_p7 = scmp.ne.s32.totalorder %s940_s17, 0 }
  0x48   : > { %s861_s22 = sand.u32 (!%p949_p7), 1, %s683_s10   ;;  %p950_p3 = scmp.ne.s32.totalorder (!%p949_p7), %s938_s15, 0 }
  0x49   : > { %142 = sbr.rel (%p949_p7) target bundleno = 468 (0x1d4), region = 28  ;;  %s475_s25 = sshll.u32 (!%p949_p7), %s861_s22, 3 }
  0x4a   : > { %s145_s23 = scalar_lea.sflag (!%p949_p7), [#allocation4], %s861_s22  ;;  %s148_s28 = scalar_lea.vmem (!%p949_p7), [#allocation3], %s475_s25 }
  0x50   : > { %666 = dma.done.wait (%p950_p3), %s145_s23, 128  }
  0x51   : > { %668 = vsyncadd (%p950_p3), %s145_s23, 4294967168  ;;  %p951_p4 = scmp.eq.s32.totalorder %s741_s13, 0 }
  0x53   : > { %670 = dma.done.wait (%p951_p4), [#allocation7], 128   ;;  %p952_p11 = pmov %p951_p4 }
  0x54   : > { %v173_v0 = vld [vmem:[%s148_s28] sm:$0xff]  ;;  %s695_s17 = smov 112   ;;  %s696_s19 = smov 127   ;;  %v702_v2 = vmov 0.0   ;;  %v183_v3 = vlaneseq  ;;  %vm292_vm8 = vcmask 1043456   ;;  %v277_v59 = vld [vmem:[#allocation6] sm:$0xff] }
  0x55   : > { %672 = vsyncadd (%p952_p11), [#allocation7], 4294967168  ;;  %205 = vrot.lane.b32.xlu1 %v173_v0, %s695_s17  ;;  %177 = vst [vmem:[#allocation2] sm:$0xf] %v173_v0  ;;  %179 = vrot.lane.b32.xlu0 %v173_v0, %s696_s19  ;;  %v175_v1 = vcombine.high %v173_v0, %v173_v0  ;;  %s697_s24 = smov 126   ;;  %s698_s15 = smov 110  }
  0x56   : > { %s699_s26 = smov 95   ;;  %s700_s27 = smov 111   ;;  %363 = vmatprep.mubr.f32.mxu0 %v702_v2  ;;  %v873_v4 = vand.u32 127, %v183_v3  ;;  %vm288_vm9 = vcmask 293888  }
  0x57   : > { %178 = vst [vmem:[#allocation2 + $0x8] sm:$0xf] %v175_v1  ;;  %s701_s29 = smov 96   ;;  %s703_s30 = smov 94  }
  0x58   : > { %vm209_vm0 = vcmp.lt.s32.totalorder %v873_v4, 112  ;;  %vm200_vm1 = vcmp.lt.s32.totalorder %v873_v4, 126  ;;  %vm185_vm2 = vcmp.lt.s32.totalorder %v873_v4, 127  ;;  %vm233_vm3 = vcmp.lt.s32.totalorder %v873_v4, 110  ;;  %s477_s3 = sshll.u32 %s861_s22, 4  ;;  %s487_s6 = sshll.u32 %s741_s13, 8 }
  0x59   : > { %196 = vrot.lane.b32.xlu0 %v173_v0, %s697_s24  ;;  %207 = vrot.lane.b32.xlu1 %v175_v1, %s695_s17  ;;  %vm257_vm4 = vcmp.lt.s32.totalorder %v873_v4, 95  ;;  %vm224_vm5 = vcmp.lt.s32.totalorder %v873_v4, 111  ;;  %vm248_vm6 = vcmp.lt.s32.totalorder %v873_v4, 96  ;;  %vm272_vm7 = vcmp.lt.s32.totalorder %v873_v4, 94  ;;  %s172_s4 = scalar_lea.vmem [#allocation8], %s477_s3  ;;  %s890_s21 = scalar_lea.hbm %s934_s2, %s487_s6 }
  0x5a   : > { %s387_s5 = sshll.u32 %s172_s4, 4  ;;  %s373_s25 = scalar_lea.sflag [#allocation5], %s861_s22  ;;  %s885_s5 = int_to_ptr.vmem [resolvable:$true] %s387_s5 }
  0x5b   : > { %s621_s23 = scalar_lea.vmem %s885_s5, 256  ;;  %s704_s13 = smov [#allocation8]  }
  0x5c   : > { %p622_p6 = scmp.ne.s32.totalorder %s885_s5, %s621_s23  ;;  %s625_s28 = sshll.u32 %s704_s13, 4  ;;  %s626_s28 = int_to_ptr.vmem [resolvable:$false] %s625_s28 }
  0x5d   : > { %198 = vrot.lane.b32.xlu1 %v175_v1, %s697_s24  ;;  %181 = vrot.lane.b32.xlu0 %v175_v1, %s696_s19  ;;  %s627_s17 = scalar_lea.vmem %s626_s28, 512  ;;  %p628_p13 = scmp.lt.s32.totalorder %s885_s5, %s626_s28 }
  0x5e   : > { %p623_p9 = pnand %p622_p6, %p812_p8  ;;  %p629_p0 = scmp.lt.s32.totalorder %s627_s17, %s621_s23 }
  0x60   : > { %p624_p12 = pneg %p623_p9  ;;  %p630_p5 = por %p629_p0, %p628_p13 }
  0x61   : > { %231 = vrot.lane.b32.xlu1 %v175_v1, %s698_s15  ;;  %229 = vrot.lane.b32.xlu0 %v173_v0, %s698_s15 }
  0x62   : > { %p631_p10 = pnand %p630_p5, %p624_p12 }
  0x65   : > { %255 = vrot.lane.b32.xlu1 %v175_v1, %s699_s26  ;;  %253 = vrot.lane.b32.xlu0 %v173_v0, %s699_s26 }
  0x69   : > { %222 = vrot.lane.b32.xlu1 %v175_v1, %s700_s27  ;;  %220 = vrot.lane.b32.xlu0 %v173_v0, %s700_s27 }
  0x6d   : > { %246 = vrot.lane.b32.xlu1 %v175_v1, %s701_s29  ;;  %244 = vrot.lane.b32.xlu0 %v173_v0, %s701_s29 }
  0x71   : > { %270 = vrot.lane.b32.xlu1 %v175_v1, %s703_s30  ;;  %268 = vrot.lane.b32.xlu0 %v173_v0, %s703_s30 }
  0xc7   : > { %v206_v5 = vpop.permute.xlu1 %205  ;;  %v180_v6 = vpop.permute.xlu0 %179 }
  0xcb   : > { %v197_v7 = vpop.permute.xlu0 %196  ;;  %v208_v8 = vpop.permute.xlu1 %207 }
  0xcc   : > { %v210_v9 = vsel %vm209_vm0, %v206_v5, %v208_v8  ;;  %v211_v10 = vsel %vm209_vm0, %v208_v8, %v206_v5 }
  0xcd   : > { %v214_v11 = vrot.slane %v210_v9, 4  ;;  %v215_v12 = vrot.slane %v211_v10, 4 }
  0xcf   : > { %218 = vst [vmem:[#allocation2 + $0x10] sm:$0xf0] %v214_v11  ;;  %219 = vst [vmem:[#allocation2 + $0x18] sm:$0xf0] %v215_v12  ;;  %v199_v13 = vpop.permute.xlu1 %198  ;;  %v182_v14 = vpop.permute.xlu0 %181 }
  0xd0   : > { %v201_v15 = vsel %vm200_vm1, %v197_v7, %v199_v13  ;;  %v202_v16 = vsel %vm200_vm1, %v199_v13, %v197_v7  ;;  %v186_v17 = vsel %vm185_vm2, %v180_v6, %v182_v14  ;;  %v187_v18 = vsel %vm185_vm2, %v182_v14, %v180_v6 }
  0xd1   : > { %203 = vst [vmem:[#allocation2 + $0x10] sm:$0xf] %v201_v15  ;;  %204 = vst [vmem:[#allocation2 + $0x18] sm:$0xf] %v202_v16  ;;  %v190_v19 = vrot.slane %v186_v17, 4  ;;  %v191_v20 = vrot.slane %v187_v18, 4 }
  0xd3   : > { %194 = vst [vmem:[#allocation2] sm:$0xf0] %v190_v19  ;;  %195 = vst [vmem:[#allocation2 + $0x8] sm:$0xf0] %v191_v20  ;;  %v232_v21 = vpop.permute.xlu1 %231  ;;  %v230_v22 = vpop.permute.xlu0 %229 }
  0xd4   : > { %v234_v23 = vsel %vm233_vm3, %v230_v22, %v232_v21  ;;  %v235_v24 = vsel %vm233_vm3, %v232_v21, %v230_v22 }
  0xd5   : > { %v238_v25 = vrot.slane %v234_v23, 4  ;;  %v239_v26 = vrot.slane %v235_v24, 4 }
  0xd7   : > { %242 = vst [vmem:[#allocation2 + $0x20] sm:$0xf0] %v238_v25  ;;  %243 = vst [vmem:[#allocation2 + $0x28] sm:$0xf0] %v239_v26  ;;  %v256_v27 = vpop.permute.xlu1 %255  ;;  %v254_v28 = vpop.permute.xlu0 %253 }
  0xd8   : > { %v258_v29 = vsel %vm257_vm4, %v254_v28, %v256_v27  ;;  %v259_v30 = vsel %vm257_vm4, %v256_v27, %v254_v28  ;;  %v281_v33 = vld [vmem:[#allocation2 + $0x18] sm:$0xff]  ;;  %v280_v36 = vld [vmem:[#allocation2 + $0x10] sm:$0xff] }
  0xd9   : > { %v262_v31 = vrot.slane %v258_v29, 4  ;;  %v263_v32 = vrot.slane %v259_v30, 4 }
  0xda   : > { %v279_v34 = vld [vmem:[#allocation2 + $0x8] sm:$0xff]  ;;  %v278_v35 = vld [vmem:[#allocation2] sm:$0xff] }
  0xdb   : > { %266 = vst [vmem:[#allocation2 + $0x30] sm:$0xf0] %v262_v31  ;;  %267 = vst [vmem:[#allocation2 + $0x38] sm:$0xf0] %v263_v32  ;;  %v223_v37 = vpop.permute.xlu1 %222  ;;  %v221_v38 = vpop.permute.xlu0 %220  ;;  %v488_v39 = vpack.c.bf16 %v281_v33, %v279_v34  ;;  %v490_v40 = vpack.c.bf16 %v280_v36, %v278_v35 }
  0xdc   : > { %v225_v41 = vsel %vm224_vm5, %v221_v38, %v223_v37  ;;  %v226_v42 = vsel %vm224_vm5, %v223_v37, %v221_v38 }
  0xdd   : > { %227 = vst [vmem:[#allocation2 + $0x20] sm:$0xf] %v225_v41  ;;  %228 = vst [vmem:[#allocation2 + $0x28] sm:$0xf] %v226_v42  ;;  %489 = vmatprep.subr.bf16.mxu0 %v488_v39 }
  0xde   : > { %491 = vmatpush1.bf16.msra.mxu0 %v490_v40 }
  0xdf   : > { %v247_v43 = vpop.permute.xlu1 %246  ;;  %v245_v44 = vpop.permute.xlu0 %244 }
  0xe0   : > { %v249_v45 = vsel %vm248_vm6, %v245_v44, %v247_v43  ;;  %v250_v46 = vsel %vm248_vm6, %v247_v43, %v245_v44 }
  0xe1   : > { %251 = vst [vmem:[#allocation2 + $0x30] sm:$0xf] %v249_v45  ;;  %252 = vst [vmem:[#allocation2 + $0x38] sm:$0xf] %v250_v46 }
  0xe3   : > { %v271_v47 = vpop.permute.xlu1 %270  ;;  %v269_v48 = vpop.permute.xlu0 %268 }
  0xe4   : > { %v273_v49 = vsel %vm272_vm7, %v269_v48, %v271_v47  ;;  %v274_v50 = vsel %vm272_vm7, %v271_v47, %v269_v48  ;;  %v283_v51 = vld [vmem:[#allocation2 + $0x28] sm:$0xff]  ;;  %v282_v53 = vld [vmem:[#allocation2 + $0x20] sm:$0xff] }
  0xe5   : > { %275 = vst [vmem:[#allocation2 + $0x40] sm:$0xf] %v273_v49  ;;  %276 = vst [vmem:[#allocation2 + $0x48] sm:$0xf] %v274_v50 }
  0xe8   : > { %v285_v52 = vld [vmem:[#allocation2 + $0x38] sm:$0xff]  ;;  %v284_v54 = vld [vmem:[#allocation2 + $0x30] sm:$0xff] }
  0xe9   : > { %v492_v55 = vpack.c.bf16 %v285_v52, %v283_v51  ;;  %v494_v56 = vpack.c.bf16 %v284_v54, %v282_v53 }
  0xeb   : > { %493 = vmatprep.subr.bf16.mxu0 %v492_v55 }
  0xec   : > { %495 = vmatpush1.bf16.msra.mxu0 %v494_v56  ;;  %v287_v57 = vld [vmem:[#allocation2 + $0x48] sm:$0xf]  ;;  %v286_v58 = vld [vmem:[#allocation2 + $0x40] sm:$0xf] }
  0xed   : > { %478 = vmatprep.subr.msk.mxu0 %vm292_vm8, %v287_v57 }
  0xf0   : > { %479 = vmatpush1.msk.msra.mxu0 %vm292_vm8, %v286_v58 }
  0xf1   : > { %480 = vmatmul.mubr.msk.f32.vlgmr.msra.gmra.mrb[0].mxu0 %vm288_vm9, %v277_v59 }
 0x1c4   : > { %v365_v60 = vpop.f32.mrb[0].mxu0 }
 0x1c5   : > { %370 = vst [vmem:[%s172_s4] sm:$0xff] %v365_v60  ;;  %v367_v61 = vpop.f32.mrb[1].mxu0 }
 0x1c6   : > { %371 = vst [vmem:[%s172_s4 + $0x8] sm:$0xff] %v367_v61 }
 0x1c7   : > { %634 = shalt.err (!%p631_p10)
}
 0x1c8   : > { %s635_s22 = scalar_lea.hbm %s890_s21, 256  ;;  %s639_s15 = scalar_lea.hbm %s934_s2, 512 }
 0x1c9   : > { %p636_p1 = scmp.ne.s32.totalorder %s890_s21, %s635_s22  ;;  %p640_p3 = scmp.lt.u32.totalorder %s890_s21, %s934_s2 }
 0x1ca   : > { %p641_p4 = scmp.lt.u32.totalorder %s639_s15, %s635_s22  ;;  %p643_p6 = scmp.lt.u32.totalorder %s635_s22, %s890_s21 }
 0x1cb   : > { %p637_p2 = pnand %p636_p1, %p812_p8 }
 0x1cc   : > { %p642_p11 = por %p641_p4, %p640_p3 }
 0x1cd   : > { %p638_p7 = pneg %p637_p2 }
 0x1ce   : > { %p644_p9 = por %p643_p6, %p642_p11 }
 0x1d0   : > { %p645_p12 = pnand %p644_p9, %p638_p7 }
 0x1d2   : > { %648 = shalt.err (!%p645_p12)
}
 0x1d3   : > { %502 = dma.vmem_to_hbm [thread:$0]  (%p812_p8), %s885_s5, 256, %s890_s21, %s373_s25  }
 0x1d4 PF: > { %s399_s29 = sand.u32 1, %s679_s9   ;;  %p953_p13 = scmp.ne.s32.totalorder %s939_s16, 0 }
 0x1d5   : > { %p954_p0 = scmp.ge.s32.totalorder %s691_s12, 2  ;;  %s400_s30 = scalar_lea.sflag [#allocation5], %s399_s29 }
 0x1d7   : > { %p513_p5 = pnand %p954_p0, %p953_p13 }
 0x1d9   : > { %674 = dma.done.wait (!%p513_p5), %s400_s30, 256  }
 0x1da   : > { %676 = vsyncadd (!%p513_p5), %s400_s30, 4294967040  ;;  %p16_p10 = scmp.ge.s32.totalorder %s768_s20, 4   ;;  %s955_s9 = smov %s683_s10 }
 0x1db   : > { %s956_s10 = smov %s687_s11  ;;  %s957_s11 = smov %s804_s7 }
 0x1dc   : > { %s958_s12 = smov %s768_s20  ;;  %18 = sbr.rel (!%p16_p10) target bundleno = 6 (0x6), region = 77 }
 0x1e3   :  { %405 = vsyncpa [#allocation4], 1 }
 0x1e4   :  { %407 = vsyncpa [#allocation4 + $0x1], 1 }
 0x1e5   :  { %408 = vsyncpa [#allocation7], 1 }
 0x1e6   :  { %409 = vsyncpa [#allocation5], 1 }
 0x1e7   :  { %411 = vsyncpa [#allocation5 + $0x1], 1 }

</bundles_post_ra>
